<compile_context>
chip_gen: v5e
topology: v5e:2x2
jax: 0.10.0
libtpu: 0.0.40
codegen_flags: <defaults>
</compile_context>

<pallas_src>
import functools

import jax
import jax.numpy as jnp
from jax import lax
from jax.experimental import pallas as pl
from jax.experimental.pallas import tpu as pltpu

_EPS = 1e-12  # matches torch.nn.functional.normalize default eps

_SQRT3 = 3.0 ** 0.5
_SQRT5 = 5.0 ** 0.5
_SQRT7 = 7.0 ** 0.5
_SQRT15 = 15.0 ** 0.5


def _sh_rows(x, y, z, ls):
    """Real spherical harmonics rows (one array per output component).

    x, y, z are arrays of identical shape.  'component' normalization
    (||Y_l(u)||^2 = 2l+1 for unit u) with the per-degree sqrt(2l+1) factor folded
    into the polynomial constants (no extra post-scale multiply per row).
    Supports l <= 3.
    """
    max_l = max(ls)
    by_l = {0: [jnp.ones_like(x)]}
    if max_l >= 1:
        by_l[1] = [_SQRT3 * x, _SQRT3 * y, _SQRT3 * z]
    if max_l >= 2:
        x2, y2, z2 = x * x, y * y, z * z
        x2z2 = x2 + z2
        # Unscaled l=2 intermediates (reused by the l=3 recursion).
        sh20 = _SQRT3 * (x * z)
        sh24 = (0.5 * _SQRT3) * (z2 - x2)
        by_l[2] = [
            _SQRT5 * sh20,
            _SQRT15 * (x * y),
            _SQRT5 * (y2 - 0.5 * x2z2),
            _SQRT15 * (y * z),
            _SQRT5 * sh24,
        ]
    if max_l >= 3:
        c0 = _SQRT7 * (5.0 / 6.0) ** 0.5
        c1 = _SQRT7 * _SQRT5
        c2 = _SQRT7 * (3.0 / 8.0) ** 0.5
        poly = 4.0 * y2 - x2z2
        by_l[3] = [
            c0 * (sh20 * z + sh24 * x),
            c1 * (sh20 * y),
            c2 * (poly * x),
            (0.5 * _SQRT7) * (y * (2.0 * y2 - 3.0 * x2z2)),
            c2 * (z * poly),
            c1 * (sh24 * y),
            c0 * (sh24 * z - sh20 * x),
        ]
    if max_l >= 4:
        # TODO(synk): extend the polynomial recursion to l >= 4 if needed.
        raise NotImplementedError("Only l <= 3 implemented in this synthetic kernel.")

    rows = []
    for l in ls:
        rows.extend(by_l[l])
    return rows


def _sh_kernel(v_ref, o_ref, *, ls, normalize, chunk):
    """v_ref: (3, S, 128) block of vectors; o_ref: (dim, S, 128) block."""
    s = v_ref.shape[1]
    # Fully-unrolled chunk loop over the sublane axis with *static* slice offsets
    # (equivalent to lax.fori_loop(..., unroll=True), but every pl.ds start is a
    # compile-time constant multiple of `chunk`).  chunk=16 keeps every f32
    # intermediate at 2 vregs so nothing spills to VMEM; the only VMEM traffic per
    # chunk is 3 input loads + `dim` output stores.
    for c in range(s // chunk):
        off = c * chunk
        x = v_ref[0, pl.ds(off, chunk), :].astype(jnp.float32)  # (chunk, 128)
        y = v_ref[1, pl.ds(off, chunk), :].astype(jnp.float32)
        z = v_ref[2, pl.ds(off, chunk), :].astype(jnp.float32)
        if normalize:
            n2 = x * x + y * y + z * z
            # 1/max(||v||, eps) == rsqrt(max(||v||^2, eps^2)); single EUP op,
            # keeps the VALU slots free.  Padded zero lanes give 0 * 1e12 = 0.
            inv = lax.rsqrt(jnp.maximum(n2, _EPS * _EPS))
            x, y, z = x * inv, y * inv, z * inv
        rows = _sh_rows(x, y, z, ls)
        # Per-component stores (no jnp.stack temporary): each store is a full-lane,
        # sublane-aligned unmasked vst straight from vregs into the output block.
        for k, r in enumerate(rows):
            o_ref[k, pl.ds(off, chunk), :] = r.astype(o_ref.dtype)


def spherical_harmonics(vectors, ls=(0, 1, 2, 3), normalize=True, *,
                        out_dtype=None, sublane_tile=512, transpose_out=True):
    """Pallas-backed equivalent of cuet.SphericalHarmonics(ls, normalize)(vectors).

    vectors: (batch, 3) -> (batch, sum(2l+1) for l in ls).

    out_dtype:    output dtype (e.g. jnp.bfloat16); in-kernel compute stays f32.
                  Defaults to the input dtype.
    sublane_tile: sublanes per grid step (512 default; 1024 is a good choice on
                  v6e/v7x, keep <=512 on v5e).
    transpose_out: if False, return the kernel-native lane-dense (dim, batch) layout
                  and skip the epilogue slice+transpose (a second mem-bound pass).
    """
    assert vectors.ndim == 2 and vectors.shape[1] == 3, vectors.shape
    ls = list(ls)
    assert ls == sorted(set(ls))
    b = vectors.shape[0]
    dim = sum(2 * l + 1 for l in ls)
    in_dtype = jnp.dtype(vectors.dtype)
    out_dtype = jnp.dtype(out_dtype) if out_dtype is not None else in_dtype

    lane = 128
    # Sublane granularity: 8 for 4-byte dtypes, 16 for bf16/fp16, etc.
    sub_in = max(8, 32 // in_dtype.itemsize)
    sub_out = max(8, 32 // out_dtype.itemsize)
    chunk = max(16, sub_in, sub_out)  # in-kernel sublane chunk (vreg-resident math)

    # Pad batch to whole (S, 128) tiles; S is a multiple of `chunk`.
    rows = pl.cdiv(b, lane)
    st = max(chunk, (int(sublane_tile) // chunk) * chunk)
    s = min(st, pl.cdiv(rows, chunk) * chunk)
    rows_p = pl.cdiv(rows, s) * s
    bp = rows_p * lane

    # (batch, 3) -> (3, batch) -> pad -> (3, rows_p, 128).  Row-major reshape is free.
    # TODO(synk): for huge batches, keep a (3, batch) layout upstream to skip this pass.
    vt = jnp.pad(vectors.T, ((0, 0), (0, bp - b))).reshape(3, rows_p, lane)

    # Scoped-VMEM budget: double-buffered input + output blocks plus headroom
    # (fits v5e/v6e/v7x defaults at S=512; the explicit limit also covers S=1024).
    in_bytes = 3 * s * lane * in_dtype.itemsize
    out_bytes = dim * s * lane * out_dtype.itemsize
    vmem_limit = int(min(max(2 * (in_bytes + out_bytes) + (4 << 20), 16 << 20), 64 << 20))

    kernel = functools.partial(_sh_kernel, ls=tuple(ls), normalize=normalize, chunk=chunk)
    out = pl.pallas_call(
        kernel,
        out_shape=jax.ShapeDtypeStruct((dim, rows_p, lane), out_dtype),
        grid=(rows_p // s,),
        in_specs=[pl.BlockSpec((3, s, lane), lambda i: (0, i, 0))],
        out_specs=pl.BlockSpec((dim, s, lane), lambda i: (0, i, 0)),
        compiler_params=pltpu.CompilerParams(
            dimension_semantics=("parallel",),
            vmem_limit_bytes=vmem_limit,
        ),
    )(vt)

    flat = out.reshape(dim, bp)[:, :b]
    if not transpose_out:
        return flat  # lane-dense (dim, batch) layout, no extra HBM pass
    # PyTorch (batch, dim) convention: this slice+transpose is an extra mem-bound
    # pass over the output; pass transpose_out=False (or fuse downstream) to avoid it.
    return flat.T


def _reference(vectors, ls, normalize):
    """Pure-JAX reference (same math, no Pallas) for a lowering-correctness check.

    NOTE: shares _sh_rows with the kernel, so it checks the Pallas lowering, not the
    SH convention itself (see TODO at top of file).
    """
    v = vectors.astype(jnp.float32)
    if normalize:
        n = jnp.sqrt(jnp.sum(v * v, axis=1, keepdims=True))
        v = v / jnp.maximum(n, _EPS)
    x, y, z = v[:, 0:1], v[:, 1:2], v[:, 2:3]
    rows = _sh_rows(x, y, z, list(ls))
    return jnp.concatenate(rows, axis=1)


if __name__ == "__main__":
    ls = [0, 1, 2, 3]
    expected_dim = sum(2 * l + 1 for l in ls)
    key = jax.random.PRNGKey(0)

    # Small, non-128-aligned batch exercises the padding / masked-edge path.
    vectors = jax.random.normal(key, (200, 3), dtype=jnp.float32)  # (batch, 3)
    ref = _reference(vectors, ls, True)

    # Default: f32 output, (batch, dim) layout.
    out = jax.block_until_ready(spherical_harmonics(vectors, ls=ls, normalize=True))
    assert out.shape == (vectors.shape[0], expected_dim), out.shape
    assert bool(jnp.allclose(out, ref, rtol=1e-5, atol=1e-5)), "mismatch (normalize)"

    # Kernel-native (dim, batch) layout (no epilogue transpose pass).
    out_t = jax.block_until_ready(
        spherical_harmonics(vectors, ls=ls, normalize=True, transpose_out=False))
    assert out_t.shape == (expected_dim, vectors.shape[0]), out_t.shape
    assert bool(jnp.allclose(out_t.T, ref, rtol=1e-5, atol=1e-5)), "mismatch (dim,batch)"

    # normalize=False path.
    out2 = jax.block_until_ready(
        spherical_harmonics(vectors[:8], ls=ls, normalize=False))
    ref2 = _reference(vectors[:8], ls, False)
    assert bool(jnp.allclose(out2, ref2, rtol=1e-5, atol=1e-5)), "mismatch (no norm)"

    # bf16 output option (f32 compute in-kernel, cast on store).
    out_bf = jax.block_until_ready(
        spherical_harmonics(vectors, ls=ls, normalize=True, out_dtype=jnp.bfloat16))
    assert out_bf.shape == (vectors.shape[0], expected_dim), out_bf.shape
    assert out_bf.dtype == jnp.bfloat16, out_bf.dtype
    assert bool(jnp.allclose(out_bf.astype(jnp.float32), ref, rtol=2e-2, atol=1e-1)), \
        "mismatch (bf16 out)"

    print("KERNEL_OK")
</pallas_src>

<mosaic_0001>
module attributes {stable_mosaic.version = 11 : i64} {
  func.func @_sh_kernel(%arg0: i32, %arg1: memref<3x16x128xf32, #tpu.memory_space<vmem>>, %arg2: memref<16x16x128xf32, #tpu.memory_space<vmem>>) attributes {dimension_semantics = [#tpu.dimension_semantics<parallel>], iteration_bounds = array<i64: 1>, scalar_prefetch = 0 : i64, scratch_operands = 0 : i64, tpu.core_type = #tpu.core_type<tc>, window_params = [{transform_indices = @transform_0, window_bounds = array<i64: 3, 16, 128>}, {transform_indices = @transform_1, window_bounds = array<i64: 16, 16, 128>}]} {
    %c0 = arith.constant 0 : index
    %c0_0 = arith.constant 0 : index
    %c0_1 = arith.constant 0 : index
    %0 = vector.load %arg1[%c0, %c0_0, %c0_1] : memref<3x16x128xf32, #tpu.memory_space<vmem>>, vector<1x16x128xf32>
    %1 = vector.shape_cast %0 : vector<1x16x128xf32> to vector<16x128xf32>
    %c1 = arith.constant 1 : index
    %c0_2 = arith.constant 0 : index
    %c0_3 = arith.constant 0 : index
    %2 = vector.load %arg1[%c1, %c0_2, %c0_3] : memref<3x16x128xf32, #tpu.memory_space<vmem>>, vector<1x16x128xf32>
    %3 = vector.shape_cast %2 : vector<1x16x128xf32> to vector<16x128xf32>
    %c2 = arith.constant 2 : index
    %c0_4 = arith.constant 0 : index
    %c0_5 = arith.constant 0 : index
    %4 = vector.load %arg1[%c2, %c0_4, %c0_5] : memref<3x16x128xf32, #tpu.memory_space<vmem>>, vector<1x16x128xf32>
    %5 = vector.shape_cast %4 : vector<1x16x128xf32> to vector<16x128xf32>
    %6 = arith.mulf %1, %1 : vector<16x128xf32>
    %7 = arith.mulf %3, %3 : vector<16x128xf32>
    %8 = arith.addf %6, %7 : vector<16x128xf32>
    %9 = arith.mulf %5, %5 : vector<16x128xf32>
    %10 = arith.addf %8, %9 : vector<16x128xf32>
    %cst = arith.constant 1.000000e-24 : f32
    %11 = vector.broadcast %cst : f32 to vector<16x128xf32>
    %12 = arith.maximumf %10, %11 : vector<16x128xf32>
    %13 = math.rsqrt %12 : vector<16x128xf32>
    %14 = arith.mulf %1, %13 : vector<16x128xf32>
    %15 = arith.mulf %3, %13 : vector<16x128xf32>
    %16 = arith.mulf %5, %13 : vector<16x128xf32>
    %cst_6 = arith.constant 1.000000e+00 : f32
    %17 = vector.broadcast %cst_6 : f32 to vector<16x128xf32>
    %cst_7 = arith.constant 1.73205078 : f32
    %18 = vector.broadcast %cst_7 : f32 to vector<16x128xf32>
    %19 = arith.mulf %18, %14 : vector<16x128xf32>
    %cst_8 = arith.constant 1.73205078 : f32
    %20 = vector.broadcast %cst_8 : f32 to vector<16x128xf32>
    %21 = arith.mulf %20, %15 : vector<16x128xf32>
    %cst_9 = arith.constant 1.73205078 : f32
    %22 = vector.broadcast %cst_9 : f32 to vector<16x128xf32>
    %23 = arith.mulf %22, %16 : vector<16x128xf32>
    %24 = arith.mulf %14, %14 : vector<16x128xf32>
    %25 = arith.mulf %15, %15 : vector<16x128xf32>
    %26 = arith.mulf %16, %16 : vector<16x128xf32>
    %27 = arith.addf %24, %26 : vector<16x128xf32>
    %28 = arith.mulf %14, %16 : vector<16x128xf32>
    %cst_10 = arith.constant 1.73205078 : f32
    %29 = vector.broadcast %cst_10 : f32 to vector<16x128xf32>
    %30 = arith.mulf %29, %28 : vector<16x128xf32>
    %31 = arith.subf %26, %24 : vector<16x128xf32>
    %cst_11 = arith.constant 0.866025388 : f32
    %32 = vector.broadcast %cst_11 : f32 to vector<16x128xf32>
    %33 = arith.mulf %32, %31 : vector<16x128xf32>
    %cst_12 = arith.constant 2.23606801 : f32
    %34 = vector.broadcast %cst_12 : f32 to vector<16x128xf32>
    %35 = arith.mulf %34, %30 : vector<16x128xf32>
    %36 = arith.mulf %14, %15 : vector<16x128xf32>
    %cst_13 = arith.constant 3.87298346 : f32
    %37 = vector.broadcast %cst_13 : f32 to vector<16x128xf32>
    %38 = arith.mulf %37, %36 : vector<16x128xf32>
    %cst_14 = arith.constant 5.000000e-01 : f32
    %39 = vector.broadcast %cst_14 : f32 to vector<16x128xf32>
    %40 = arith.mulf %39, %27 : vector<16x128xf32>
    %41 = arith.subf %25, %40 : vector<16x128xf32>
    %cst_15 = arith.constant 2.23606801 : f32
    %42 = vector.broadcast %cst_15 : f32 to vector<16x128xf32>
    %43 = arith.mulf %42, %41 : vector<16x128xf32>
    %44 = arith.mulf %15, %16 : vector<16x128xf32>
    %cst_16 = arith.constant 3.87298346 : f32
    %45 = vector.broadcast %cst_16 : f32 to vector<16x128xf32>
    %46 = arith.mulf %45, %44 : vector<16x128xf32>
    %cst_17 = arith.constant 2.23606801 : f32
    %47 = vector.broadcast %cst_17 : f32 to vector<16x128xf32>
    %48 = arith.mulf %47, %33 : vector<16x128xf32>
    %cst_18 = arith.constant 4.000000e+00 : f32
    %49 = vector.broadcast %cst_18 : f32 to vector<16x128xf32>
    %50 = arith.mulf %49, %25 : vector<16x128xf32>
    %51 = arith.subf %50, %27 : vector<16x128xf32>
    %52 = arith.mulf %30, %16 : vector<16x128xf32>
    %53 = arith.mulf %33, %14 : vector<16x128xf32>
    %54 = arith.addf %52, %53 : vector<16x128xf32>
    %cst_19 = arith.constant 2.41522956 : f32
    %55 = vector.broadcast %cst_19 : f32 to vector<16x128xf32>
    %56 = arith.mulf %55, %54 : vector<16x128xf32>
    %57 = arith.mulf %30, %15 : vector<16x128xf32>
    %cst_20 = arith.constant 5.916080e+00 : f32
    %58 = vector.broadcast %cst_20 : f32 to vector<16x128xf32>
    %59 = arith.mulf %58, %57 : vector<16x128xf32>
    %60 = arith.mulf %51, %14 : vector<16x128xf32>
    %cst_21 = arith.constant 1.62018514 : f32
    %61 = vector.broadcast %cst_21 : f32 to vector<16x128xf32>
    %62 = arith.mulf %61, %60 : vector<16x128xf32>
    %cst_22 = arith.constant 2.000000e+00 : f32
    %63 = vector.broadcast %cst_22 : f32 to vector<16x128xf32>
    %64 = arith.mulf %63, %25 : vector<16x128xf32>
    %cst_23 = arith.constant 3.000000e+00 : f32
    %65 = vector.broadcast %cst_23 : f32 to vector<16x128xf32>
    %66 = arith.mulf %65, %27 : vector<16x128xf32>
    %67 = arith.subf %64, %66 : vector<16x128xf32>
    %68 = arith.mulf %15, %67 : vector<16x128xf32>
    %cst_24 = arith.constant 1.32287562 : f32
    %69 = vector.broadcast %cst_24 : f32 to vector<16x128xf32>
    %70 = arith.mulf %69, %68 : vector<16x128xf32>
    %71 = arith.mulf %16, %51 : vector<16x128xf32>
    %cst_25 = arith.constant 1.62018514 : f32
    %72 = vector.broadcast %cst_25 : f32 to vector<16x128xf32>
    %73 = arith.mulf %72, %71 : vector<16x128xf32>
    %74 = arith.mulf %33, %15 : vector<16x128xf32>
    %cst_26 = arith.constant 5.916080e+00 : f32
    %75 = vector.broadcast %cst_26 : f32 to vector<16x128xf32>
    %76 = arith.mulf %75, %74 : vector<16x128xf32>
    %77 = arith.mulf %33, %16 : vector<16x128xf32>
    %78 = arith.mulf %30, %14 : vector<16x128xf32>
    %79 = arith.subf %77, %78 : vector<16x128xf32>
    %cst_27 = arith.constant 2.41522956 : f32
    %80 = vector.broadcast %cst_27 : f32 to vector<16x128xf32>
    %81 = arith.mulf %80, %79 : vector<16x128xf32>
    %c0_28 = arith.constant 0 : index
    %c0_29 = arith.constant 0 : index
    %c0_30 = arith.constant 0 : index
    %82 = vector.load %arg2[%c0_28, %c0_29, %c0_30] : memref<16x16x128xf32, #tpu.memory_space<vmem>>, vector<1x16x128xf32>
    %83 = vector.shape_cast %82 : vector<1x16x128xf32> to vector<16x128xf32>
    %84 = vector.shape_cast %17 : vector<16x128xf32> to vector<1x16x128xf32>
    tpu.vector_store %arg2[%c0_28, %c0_29, %c0_30], %84 {strides = array<i32>} : memref<16x16x128xf32, #tpu.memory_space<vmem>>, vector<1x16x128xf32>,
    %c1_31 = arith.constant 1 : index
    %c0_32 = arith.constant 0 : index
    %c0_33 = arith.constant 0 : index
    %85 = vector.load %arg2[%c1_31, %c0_32, %c0_33] : memref<16x16x128xf32, #tpu.memory_space<vmem>>, vector<1x16x128xf32>
    %86 = vector.shape_cast %85 : vector<1x16x128xf32> to vector<16x128xf32>
    %87 = vector.shape_cast %19 : vector<16x128xf32> to vector<1x16x128xf32>
    tpu.vector_store %arg2[%c1_31, %c0_32, %c0_33], %87 {strides = array<i32>} : memref<16x16x128xf32, #tpu.memory_space<vmem>>, vector<1x16x128xf32>,
    %c2_34 = arith.constant 2 : index
    %c0_35 = arith.constant 0 : index
    %c0_36 = arith.constant 0 : index
    %88 = vector.load %arg2[%c2_34, %c0_35, %c0_36] : memref<16x16x128xf32, #tpu.memory_space<vmem>>, vector<1x16x128xf32>
    %89 = vector.shape_cast %88 : vector<1x16x128xf32> to vector<16x128xf32>
    %90 = vector.shape_cast %21 : vector<16x128xf32> to vector<1x16x128xf32>
    tpu.vector_store %arg2[%c2_34, %c0_35, %c0_36], %90 {strides = array<i32>} : memref<16x16x128xf32, #tpu.memory_space<vmem>>, vector<1x16x128xf32>,
    %c3 = arith.constant 3 : index
    %c0_37 = arith.constant 0 : index
    %c0_38 = arith.constant 0 : index
    %91 = vector.load %arg2[%c3, %c0_37, %c0_38] : memref<16x16x128xf32, #tpu.memory_space<vmem>>, vector<1x16x128xf32>
    %92 = vector.shape_cast %91 : vector<1x16x128xf32> to vector<16x128xf32>
    %93 = vector.shape_cast %23 : vector<16x128xf32> to vector<1x16x128xf32>
    tpu.vector_store %arg2[%c3, %c0_37, %c0_38], %93 {strides = array<i32>} : memref<16x16x128xf32, #tpu.memory_space<vmem>>, vector<1x16x128xf32>,
    %c4 = arith.constant 4 : index
    %c0_39 = arith.constant 0 : index
    %c0_40 = arith.constant 0 : index
    %94 = vector.load %arg2[%c4, %c0_39, %c0_40] : memref<16x16x128xf32, #tpu.memory_space<vmem>>, vector<1x16x128xf32>
    %95 = vector.shape_cast %94 : vector<1x16x128xf32> to vector<16x128xf32>
    %96 = vector.shape_cast %35 : vector<16x128xf32> to vector<1x16x128xf32>
    tpu.vector_store %arg2[%c4, %c0_39, %c0_40], %96 {strides = array<i32>} : memref<16x16x128xf32, #tpu.memory_space<vmem>>, vector<1x16x128xf32>,
    %c5 = arith.constant 5 : index
    %c0_41 = arith.constant 0 : index
    %c0_42 = arith.constant 0 : index
    %97 = vector.load %arg2[%c5, %c0_41, %c0_42] : memref<16x16x128xf32, #tpu.memory_space<vmem>>, vector<1x16x128xf32>
    %98 = vector.shape_cast %97 : vector<1x16x128xf32> to vector<16x128xf32>
    %99 = vector.shape_cast %38 : vector<16x128xf32> to vector<1x16x128xf32>
    tpu.vector_store %arg2[%c5, %c0_41, %c0_42], %99 {strides = array<i32>} : memref<16x16x128xf32, #tpu.memory_space<vmem>>, vector<1x16x128xf32>,
    %c6 = arith.constant 6 : index
    %c0_43 = arith.constant 0 : index
    %c0_44 = arith.constant 0 : index
    %100 = vector.load %arg2[%c6, %c0_43, %c0_44] : memref<16x16x128xf32, #tpu.memory_space<vmem>>, vector<1x16x128xf32>
    %101 = vector.shape_cast %100 : vector<1x16x128xf32> to vector<16x128xf32>
    %102 = vector.shape_cast %43 : vector<16x128xf32> to vector<1x16x128xf32>
    tpu.vector_store %arg2[%c6, %c0_43, %c0_44], %102 {strides = array<i32>} : memref<16x16x128xf32, #tpu.memory_space<vmem>>, vector<1x16x128xf32>,
    %c7 = arith.constant 7 : index
    %c0_45 = arith.constant 0 : index
    %c0_46 = arith.constant 0 : index
    %103 = vector.load %arg2[%c7, %c0_45, %c0_46] : memref<16x16x128xf32, #tpu.memory_space<vmem>>, vector<1x16x128xf32>
    %104 = vector.shape_cast %103 : vector<1x16x128xf32> to vector<16x128xf32>
    %105 = vector.shape_cast %46 : vector<16x128xf32> to vector<1x16x128xf32>
    tpu.vector_store %arg2[%c7, %c0_45, %c0_46], %105 {strides = array<i32>} : memref<16x16x128xf32, #tpu.memory_space<vmem>>, vector<1x16x128xf32>,
    %c8 = arith.constant 8 : index
    %c0_47 = arith.constant 0 : index
    %c0_48 = arith.constant 0 : index
    %106 = vector.load %arg2[%c8, %c0_47, %c0_48] : memref<16x16x128xf32, #tpu.memory_space<vmem>>, vector<1x16x128xf32>
    %107 = vector.shape_cast %106 : vector<1x16x128xf32> to vector<16x128xf32>
    %108 = vector.shape_cast %48 : vector<16x128xf32> to vector<1x16x128xf32>
    tpu.vector_store %arg2[%c8, %c0_47, %c0_48], %108 {strides = array<i32>} : memref<16x16x128xf32, #tpu.memory_space<vmem>>, vector<1x16x128xf32>,
    %c9 = arith.constant 9 : index
    %c0_49 = arith.constant 0 : index
    %c0_50 = arith.constant 0 : index
    %109 = vector.load %arg2[%c9, %c0_49, %c0_50] : memref<16x16x128xf32, #tpu.memory_space<vmem>>, vector<1x16x128xf32>
    %110 = vector.shape_cast %109 : vector<1x16x128xf32> to vector<16x128xf32>
    %111 = vector.shape_cast %56 : vector<16x128xf32> to vector<1x16x128xf32>
    tpu.vector_store %arg2[%c9, %c0_49, %c0_50], %111 {strides = array<i32>} : memref<16x16x128xf32, #tpu.memory_space<vmem>>, vector<1x16x128xf32>,
    %c10 = arith.constant 10 : index
    %c0_51 = arith.constant 0 : index
    %c0_52 = arith.constant 0 : index
    %112 = vector.load %arg2[%c10, %c0_51, %c0_52] : memref<16x16x128xf32, #tpu.memory_space<vmem>>, vector<1x16x128xf32>
    %113 = vector.shape_cast %112 : vector<1x16x128xf32> to vector<16x128xf32>
    %114 = vector.shape_cast %59 : vector<16x128xf32> to vector<1x16x128xf32>
    tpu.vector_store %arg2[%c10, %c0_51, %c0_52], %114 {strides = array<i32>} : memref<16x16x128xf32, #tpu.memory_space<vmem>>, vector<1x16x128xf32>,
    %c11 = arith.constant 11 : index
    %c0_53 = arith.constant 0 : index
    %c0_54 = arith.constant 0 : index
    %115 = vector.load %arg2[%c11, %c0_53, %c0_54] : memref<16x16x128xf32, #tpu.memory_space<vmem>>, vector<1x16x128xf32>
    %116 = vector.shape_cast %115 : vector<1x16x128xf32> to vector<16x128xf32>
    %117 = vector.shape_cast %62 : vector<16x128xf32> to vector<1x16x128xf32>
    tpu.vector_store %arg2[%c11, %c0_53, %c0_54], %117 {strides = array<i32>} : memref<16x16x128xf32, #tpu.memory_space<vmem>>, vector<1x16x128xf32>,
    %c12 = arith.constant 12 : index
    %c0_55 = arith.constant 0 : index
    %c0_56 = arith.constant 0 : index
    %118 = vector.load %arg2[%c12, %c0_55, %c0_56] : memref<16x16x128xf32, #tpu.memory_space<vmem>>, vector<1x16x128xf32>
    %119 = vector.shape_cast %118 : vector<1x16x128xf32> to vector<16x128xf32>
    %120 = vector.shape_cast %70 : vector<16x128xf32> to vector<1x16x128xf32>
    tpu.vector_store %arg2[%c12, %c0_55, %c0_56], %120 {strides = array<i32>} : memref<16x16x128xf32, #tpu.memory_space<vmem>>, vector<1x16x128xf32>,
    %c13 = arith.constant 13 : index
    %c0_57 = arith.constant 0 : index
    %c0_58 = arith.constant 0 : index
    %121 = vector.load %arg2[%c13, %c0_57, %c0_58] : memref<16x16x128xf32, #tpu.memory_space<vmem>>, vector<1x16x128xf32>
    %122 = vector.shape_cast %121 : vector<1x16x128xf32> to vector<16x128xf32>
    %123 = vector.shape_cast %73 : vector<16x128xf32> to vector<1x16x128xf32>
    tpu.vector_store %arg2[%c13, %c0_57, %c0_58], %123 {strides = array<i32>} : memref<16x16x128xf32, #tpu.memory_space<vmem>>, vector<1x16x128xf32>,
    %c14 = arith.constant 14 : index
    %c0_59 = arith.constant 0 : index
    %c0_60 = arith.constant 0 : index
    %124 = vector.load %arg2[%c14, %c0_59, %c0_60] : memref<16x16x128xf32, #tpu.memory_space<vmem>>, vector<1x16x128xf32>
    %125 = vector.shape_cast %124 : vector<1x16x128xf32> to vector<16x128xf32>
    %126 = vector.shape_cast %76 : vector<16x128xf32> to vector<1x16x128xf32>
    tpu.vector_store %arg2[%c14, %c0_59, %c0_60], %126 {strides = array<i32>} : memref<16x16x128xf32, #tpu.memory_space<vmem>>, vector<1x16x128xf32>,
    %c15 = arith.constant 15 : index
    %c0_61 = arith.constant 0 : index
    %c0_62 = arith.constant 0 : index
    %127 = vector.load %arg2[%c15, %c0_61, %c0_62] : memref<16x16x128xf32, #tpu.memory_space<vmem>>, vector<1x16x128xf32>
    %128 = vector.shape_cast %127 : vector<1x16x128xf32> to vector<16x128xf32>
    %129 = vector.shape_cast %81 : vector<16x128xf32> to vector<1x16x128xf32>
    tpu.vector_store %arg2[%c15, %c0_61, %c0_62], %129 {strides = array<i32>} : memref<16x16x128xf32, #tpu.memory_space<vmem>>, vector<1x16x128xf32>,
    return
  }
  func.func @transform_0(%arg0: i32) -> (i32, i32, i32) {
    %c0_i32 = arith.constant 0 : i32
    %c0_i32_0 = arith.constant 0 : i32
    %c0_i32_1 = arith.constant 0 : i32
    return %c0_i32, %arg0, %c0_i32_0 : i32, i32, i32
  }
  func.func @transform_1(%arg0: i32) -> (i32, i32, i32) {
    %c0_i32 = arith.constant 0 : i32
    %c0_i32_0 = arith.constant 0 : i32
    %c0_i32_1 = arith.constant 0 : i32
    return %c0_i32, %arg0, %c0_i32_0 : i32, i32, i32
  }
}

</mosaic_0001>

<bundles_post_ra>
// kernel: tpu_custom_call.1
= control target key start
LH: loop header
LB: loop body
LE: loop exit
PB: predicated region body
PF: predicated region fallthrough
CT: control target
= control target key end

     0   :  { %6 = vsyncpa [#allocation3], 0  ;;  %s383_s0 = inlined_call_operand.hbm [shape: f32[3,16,128], index: 0, kind: input, shape index: {}]   ;;  %s384_s1 = inlined_call_operand.hbm [shape: f32[16,16,128], index: 1, kind: output, shape index: {}]  }
   0x1   :  { %7 = vsyncpa [#allocation4], 0  ;;  %s12_s8 = sshll.u32 %s383_s0, 4  ;;  %s284_s9 = smov [#allocation2]   ;;  %s13_s8 = int_to_ptr.hbm [resolvable:$true] %s12_s8 }
   0x2   :  { %s14_s10 = sshll.u32 %s284_s9, 4  ;;  %s285_s11 = smov 128   ;;  %s15_s10 = int_to_ptr.vmem [resolvable:$true] %s14_s10 }
   0x3   :  { %s286_s12 = smov 8  }
   0x4   :  { %20 = dma.hbm_to_vmem [thread:$0]  %s13_s8, 768, %s15_s10, [#allocation3], %s285_s11, %s285_s11, %s286_s12  }
   0x5   :  { %280 = dma.done.wait [#allocation3], 768  }
   0x6   :  { %281 = vsyncadd [#allocation3], 4294966528  ;;  %v287_v0 = vmov 1.0   ;;  %v25_v1 = vld [vmem:[#allocation2] sm:$0xff]  ;;  %v28_v2 = vld [vmem:[#allocation2 + $0x10] sm:$0xff]  ;;  %s288_s0 = smov [#allocation5]  }
   0x7   :  { %157 = vst [vmem:[#allocation5] sm:$0xff] %v287_v0  ;;  %v31_v3 = vld [vmem:[#allocation2 + $0x20] sm:$0xff]  ;;  %v33_v4 = vmul.f32 %v25_v1, %v25_v1  ;;  %v35_v5 = vmul.f32 %v28_v2, %v28_v2  ;;  %v26_v7 = vld [vmem:[#allocation2 + $0x8] sm:$0xff]  ;;  %v29_v8 = vld [vmem:[#allocation2 + $0x18] sm:$0xff]  ;;  %s208_s13 = sshll.u32 %s288_s0, 4  ;;  %s210_s16 = sshll.u32 %s384_s1, 4  ;;  %s209_s13 = int_to_ptr.vmem [resolvable:$true] %s208_s13  ;;  %s211_s16 = int_to_ptr.hbm [resolvable:$true] %s210_s16 }
   0x8   :  { %158 = vst [vmem:[#allocation5 + $0x8] sm:$0xff] %v287_v0  ;;  %v39_v6 = vmul.f32 %v31_v3, %v31_v3  ;;  %v32_v9 = vld [vmem:[#allocation2 + $0x28] sm:$0xff]  ;;  %v34_v10 = vmul.f32 %v26_v7, %v26_v7  ;;  %v36_v11 = vmul.f32 %v29_v8, %v29_v8 }
   0x9   :  { %v40_v12 = vmul.f32 %v32_v9, %v32_v9  ;;  %v37_v13 = vadd.f32 %v35_v5, %v33_v4 }
   0xa   :  { %v38_v14 = vadd.f32 %v36_v11, %v34_v10 }
   0xb   :  { %v41_v15 = vadd.f32 %v39_v6, %v37_v13 }
   0xc   :  { %v42_v16 = vadd.f32 %v40_v12, %v38_v14 }
   0xd   :  { %v43_v17 = vmax.f32 %v41_v15, 1e-24 }
   0xe   :  { %v44_v18 = vmax.f32 %v42_v16, 1e-24 }
   0xf   :  { %228 = vrsqrt.f32 %v43_v17  ;;  %vm51_vm0 = vweird.f32 %v43_v17 }
  0x10   :  { %230 = vrsqrt.f32 %v44_v18  ;;  %vm61_vm2 = vweird.f32 %v44_v18 }
  0x15   :  { %v229_v19 = vpop.eup %228 }
  0x16   :  { %v231_v20 = vpop.eup %230  ;;  %v46_v21 = vmul.f32 %v229_v19, %v43_v17  ;;  %vm52_vm1 = vweird.f32 %v229_v19 }
  0x17   :  { %v56_v22 = vmul.f32 %v231_v20, %v44_v18  ;;  %vm62_vm3 = vweird.f32 %v231_v20  ;;  %vm53_vm4 = vmor %vm51_vm0, %vm52_vm1 }
  0x18   :  { %v47_v23 = vmul.f32 %v229_v19, %v46_v21  ;;  %vm63_vm5 = vmor %vm61_vm2, %vm62_vm3 }
  0x19   :  { %v57_v24 = vmul.f32 %v231_v20, %v56_v22 }
  0x1a   :  { %v48_v25 = vmul.f32 0.5, %v47_v23 }
  0x1b   :  { %v58_v26 = vmul.f32 0.5, %v57_v24 }
  0x1c   :  { %v49_v27 = vsub.f32 1.5, %v48_v25 }
  0x1d   :  { %v59_v28 = vsub.f32 1.5, %v58_v26 }
  0x1e   :  { %v50_v29 = vmul.f32 %v229_v19, %v49_v27 }
  0x1f   :  { %v60_v30 = vmul.f32 %v231_v20, %v59_v28 }
  0x20   :  { %v54_v31 = vsel %vm53_vm4, %v229_v19, %v50_v29 }
  0x21   :  { %v305_v32 = vmul.f32 %v54_v31, %v25_v1  ;;  %v64_v33 = vsel %vm63_vm5, %v231_v20, %v60_v30  ;;  %v307_v34 = vmul.f32 %v54_v31, %v28_v2  ;;  %v309_v35 = vmul.f32 %v54_v31, %v31_v3 }
  0x22   :  { %v311_v36 = vmul.f32 %v64_v33, %v26_v7  ;;  %v313_v37 = vmul.f32 %v64_v33, %v29_v8  ;;  %v315_v38 = vmul.f32 %v64_v33, %v32_v9 }
  0x23   :  { %v71_v39 = vmul.f32 1.7320508, %v305_v32  ;;  %v73_v40 = vmul.f32 1.7320508, %v307_v34  ;;  %v85_v41 = vmul.f32 %v309_v35, %v305_v32  ;;  %v75_v44 = vmul.f32 1.7320508, %v309_v35 }
  0x24   :  { %v72_v42 = vmul.f32 1.7320508, %v311_v36  ;;  %v74_v43 = vmul.f32 1.7320508, %v313_v37  ;;  %v86_v45 = vmul.f32 %v315_v38, %v311_v36  ;;  %v76_v46 = vmul.f32 1.7320508, %v315_v38 }
  0x25   :  { %160 = vst [vmem:[#allocation5 + $0x10] sm:$0xff] %v71_v39  ;;  %v327_v47 = vmul.f32 1.7320508, %v85_v41  ;;  %v95_v48 = vmul.f32 %v307_v34, %v305_v32  ;;  %v77_v49 = vmul.f32 %v305_v32, %v305_v32  ;;  %v96_v51 = vmul.f32 %v313_v37, %v311_v36 }
  0x26   :  { %161 = vst [vmem:[#allocation5 + $0x18] sm:$0xff] %v72_v42  ;;  %v333_v50 = vmul.f32 1.7320508, %v86_v45  ;;  %v81_v52 = vmul.f32 %v309_v35, %v309_v35  ;;  %v78_v53 = vmul.f32 %v311_v36, %v311_v36  ;;  %v79_v55 = vmul.f32 %v307_v34, %v307_v34 }
  0x27   :  { %163 = vst [vmem:[#allocation5 + $0x20] sm:$0xff] %v73_v40  ;;  %v93_v54 = vmul.f32 2.236068, %v327_v47  ;;  %v82_v56 = vmul.f32 %v315_v38, %v315_v38  ;;  %v97_v58 = vmul.f32 3.8729835, %v95_v48  ;;  %v105_v60 = vmul.f32 %v309_v35, %v307_v34 }
  0x28   :  { %164 = vst [vmem:[#allocation5 + $0x28] sm:$0xff] %v74_v43  ;;  %v94_v57 = vmul.f32 2.236068, %v333_v50  ;;  %v83_v59 = vadd.f32 %v81_v52, %v77_v49  ;;  %v106_v62 = vmul.f32 %v315_v38, %v313_v37  ;;  %v89_v63 = vsub.f32 %v81_v52, %v77_v49 }
  0x29   :  { %166 = vst [vmem:[#allocation5 + $0x30] sm:$0xff] %v75_v44  ;;  %v84_v61 = vadd.f32 %v82_v56, %v78_v53  ;;  %v90_v0 = vsub.f32 %v82_v56, %v78_v53  ;;  %v98_v1 = vmul.f32 3.8729835, %v96_v51  ;;  %v80_v3 = vmul.f32 %v313_v37, %v313_v37 }
  0x2a   :  { %167 = vst [vmem:[#allocation5 + $0x38] sm:$0xff] %v76_v46  ;;  %v99_v2 = vmul.f32 0.5, %v83_v59  ;;  %v107_v4 = vmul.f32 3.8729835, %v105_v60  ;;  %v91_v6 = vmul.f32 0.8660254, %v89_v63  ;;  %v115_v7 = vmul.f32 %v327_v47, %v309_v35 }
  0x2b   :  { %169 = vst [vmem:[#allocation5 + $0x40] sm:$0xff] %v93_v54  ;;  %v100_v5 = vmul.f32 0.5, %v84_v61  ;;  %v116_v8 = vmul.f32 %v333_v50, %v315_v38  ;;  %v108_v10 = vmul.f32 3.8729835, %v106_v62  ;;  %v92_v11 = vmul.f32 0.8660254, %v90_v0 }
  0x2c   :  { %170 = vst [vmem:[#allocation5 + $0x48] sm:$0xff] %v94_v57  ;;  %v101_v9 = vsub.f32 %v79_v55, %v99_v2  ;;  %v111_v12 = vmul.f32 4.0, %v79_v55  ;;  %v117_v14 = vmul.f32 %v91_v6, %v305_v32  ;;  %v123_v15 = vmul.f32 %v327_v47, %v307_v34 }
  0x2d   :  { %172 = vst [vmem:[#allocation5 + $0x50] sm:$0xff] %v97_v58  ;;  %v102_v13 = vsub.f32 %v80_v3, %v100_v5  ;;  %v124_v16 = vmul.f32 %v333_v50, %v313_v37  ;;  %v109_v18 = vmul.f32 2.236068, %v91_v6  ;;  %v118_v19 = vmul.f32 %v92_v11, %v311_v36 }
  0x2e   :  { %173 = vst [vmem:[#allocation5 + $0x58] sm:$0xff] %v98_v1  ;;  %v103_v17 = vmul.f32 2.236068, %v101_v9  ;;  %v113_v20 = vsub.f32 %v111_v12, %v83_v59  ;;  %v110_v22 = vmul.f32 2.236068, %v92_v11  ;;  %v119_v23 = vadd.f32 %v117_v14, %v115_v7 }
  0x2f   :  { %v104_v21 = vmul.f32 2.236068, %v102_v13  ;;  %178 = vst [vmem:[#allocation5 + $0x70] sm:$0xff] %v107_v4  ;;  %v112_v24 = vmul.f32 4.0, %v80_v3  ;;  %v120_v25 = vadd.f32 %v118_v19, %v116_v8  ;;  %v131_v27 = vmul.f32 2.0, %v79_v55 }
  0x30   :  { %175 = vst [vmem:[#allocation5 + $0x60] sm:$0xff] %v103_v17  ;;  %v127_v26 = vmul.f32 %v113_v20, %v305_v32  ;;  %v133_v28 = vmul.f32 3.0, %v83_v59  ;;  %v121_v29 = vmul.f32 2.4152296, %v119_v23  ;;  %v132_v31 = vmul.f32 2.0, %v80_v3 }
  0x31   :  { %176 = vst [vmem:[#allocation5 + $0x68] sm:$0xff] %v104_v21  ;;  %v114_v30 = vsub.f32 %v112_v24, %v84_v61  ;;  %v134_v33 = vmul.f32 3.0, %v84_v61  ;;  %v122_v39 = vmul.f32 2.4152296, %v120_v25  ;;  %v125_v41 = vmul.f32 5.91608, %v123_v15 }
  0x32   :  { %179 = vst [vmem:[#allocation5 + $0x78] sm:$0xff] %v108_v10  ;;  %v135_v40 = vsub.f32 %v131_v27, %v133_v28  ;;  %v126_v44 = vmul.f32 5.91608, %v124_v16  ;;  %v129_v45 = vmul.f32 1.6201851, %v127_v26  ;;  %v141_v49 = vmul.f32 %v113_v20, %v309_v35 }
  0x33   :  { %181 = vst [vmem:[#allocation5 + $0x80] sm:$0xff] %v109_v18  ;;  %v128_v42 = vmul.f32 %v114_v30, %v311_v36  ;;  %v136_v43 = vsub.f32 %v132_v31, %v134_v33  ;;  %v149_v51 = vmul.f32 %v91_v6, %v309_v35  ;;  %v151_v52 = vmul.f32 %v327_v47, %v305_v32 }
  0x34   :  { %182 = vst [vmem:[#allocation5 + $0x88] sm:$0xff] %v110_v22  ;;  %v137_v46 = vmul.f32 %v135_v40, %v307_v34  ;;  %v142_v54 = vmul.f32 %v114_v30, %v315_v38  ;;  %v150_v55 = vmul.f32 %v92_v11, %v315_v38  ;;  %v152_v56 = vmul.f32 %v333_v50, %v311_v36 }
  0x35   :  { %184 = vst [vmem:[#allocation5 + $0x90] sm:$0xff] %v121_v29  ;;  %v138_v48 = vmul.f32 %v136_v43, %v313_v37  ;;  %v130_v53 = vmul.f32 1.6201851, %v128_v42  ;;  %v145_v58 = vmul.f32 %v91_v6, %v307_v34  ;;  %v146_v35 = vmul.f32 %v92_v11, %v313_v37 }
  0x36   :  { %185 = vst [vmem:[#allocation5 + $0x98] sm:$0xff] %v122_v39  ;;  %v139_v57 = vmul.f32 1.3228756, %v137_v46  ;;  %v143_v60 = vmul.f32 1.6201851, %v141_v49  ;;  %v153_v32 = vsub.f32 %v149_v51, %v151_v52  ;;  %v154_v61 = vsub.f32 %v150_v55, %v152_v56 }
  0x37   :  { %187 = vst [vmem:[#allocation5 + $0xa0] sm:$0xff] %v125_v41  ;;  %v140_v59 = vmul.f32 1.3228756, %v138_v48  ;;  %v144_v47 = vmul.f32 1.6201851, %v142_v54 }
  0x38   :  { %188 = vst [vmem:[#allocation5 + $0xa8] sm:$0xff] %v126_v44  ;;  %v147_v62 = vmul.f32 5.91608, %v145_v58  ;;  %v148_v38 = vmul.f32 5.91608, %v146_v35 }
  0x39   :  { %190 = vst [vmem:[#allocation5 + $0xb0] sm:$0xff] %v129_v45  ;;  %v155_v36 = vmul.f32 2.4152296, %v153_v32  ;;  %v156_v34 = vmul.f32 2.4152296, %v154_v61 }
  0x3a   :  { %191 = vst [vmem:[#allocation5 + $0xb8] sm:$0xff] %v130_v53 }
  0x3b   :  { %193 = vst [vmem:[#allocation5 + $0xc0] sm:$0xff] %v139_v57 }
  0x3c   :  { %194 = vst [vmem:[#allocation5 + $0xc8] sm:$0xff] %v140_v59 }
  0x3d   :  { %196 = vst [vmem:[#allocation5 + $0xd0] sm:$0xff] %v143_v60 }
  0x3e   :  { %197 = vst [vmem:[#allocation5 + $0xd8] sm:$0xff] %v144_v47 }
  0x3f   :  { %199 = vst [vmem:[#allocation5 + $0xe0] sm:$0xff] %v147_v62 }
  0x40   :  { %200 = vst [vmem:[#allocation5 + $0xe8] sm:$0xff] %v148_v38 }
  0x41   :  { %202 = vst [vmem:[#allocation5 + $0xf0] sm:$0xff] %v155_v36 }
  0x42   :  { %203 = vst [vmem:[#allocation5 + $0xf8] sm:$0xff] %v156_v34 }
  0x43   :  { %216 = dma.vmem_to_hbm [thread:$0]  %s209_s13, 4096, %s211_s16, [#allocation4], %s285_s11, %s285_s11, %s286_s12  }
  0x44   :  { %282 = dma.done.wait [#allocation4], 4096  }
  0x45   :  { %283 = vsyncadd [#allocation4], 4294963200 }
  0x46   :  { %221 = vsyncpa [#allocation3], 1 }
  0x47   :  { %222 = vsyncpa [#allocation4], 1 }

</bundles_post_ra>
